<compile_context>
chip_gen: v6e
topology: v6e:2x2x1
jax: 0.10.0
libtpu: 0.0.40
codegen_flags: <defaults>
</compile_context>

<pallas_src>
import functools

import jax
import jax.numpy as jnp
from jax import lax
from jax.experimental import pallas as pl
from jax.experimental.pallas import tpu as pltpu


# ----------------------------------------------------------------------------
# Fused Pallas kernel: whole bottleneck, B images per grid step, channel-major.
# ----------------------------------------------------------------------------
def _block_kernel(x_ref, w1_ref, b1_ref, w2_ref, b2_ref, wcat_ref, bcat_ref,
                  o_ref, pad_ref, *, B, H, W, Ho, Wo, stride, conv_shortcut):
    Cin = x_ref.shape[1]
    GW = w1_ref.shape[0]
    HW = H * W

    # Resident (BN-folded, bf16) weights + f32 biases.
    w1 = w1_ref[...]
    w2 = w2_ref[...]
    wcat = wcat_ref[...]
    b1 = b1_ref[...]
    b2 = b2_ref[...]
    bcat = bcat_ref[...]

    # Lane masks implementing the horizontal zero padding of the 3x3 conv
    # (hoisted out of the tap loop: JAX does not CSE broadcasts).
    xcol = lax.broadcasted_iota(jnp.int32, (1, HW), 1) % W
    left_ok = xcol != 0          # tap reads column x-1 -> invalid at x == 0
    right_ok = xcol != W - 1     # tap reads column x+1 -> invalid at x == W-1
    halo_zeros = jnp.zeros((GW, W + 1), jnp.float32)

    for b in range(B):
        xb = x_ref[b]                                        # (Cin, HW) f32

        # ---- conv1 (1x1) + folded bn1 + relu --------------------------------
        out1 = jnp.maximum(
            jnp.dot(w1, xb.astype(jnp.bfloat16),
                    preferred_element_type=jnp.float32) + b1,
            0.0)                                             # (GW, HW) f32

        # ---- padded slab: zero ONLY the vertical halo -----------------------
        # pad_ref lane layout: lane 1 + (iy+1)*W + ix holds pixel (iy, ix);
        # lanes [0, W+1) and [1+(H+1)*W, end) are the zero halo (top/bottom
        # pad rows + guard lanes).  The interior is fully overwritten.
        pad_ref[:, :W + 1] = halo_zeros
        pad_ref[:, 1 + (H + 1) * W:] = halo_zeros
        pad_ref[:, 1 + W:1 + W + HW] = out1

        # ---- conv2: grouped 3x3 as ONE K = 9*GW matmul -----------------------
        # Tap (dy, dx) for output pixel o = y*W + x is the lane slice starting
        # at dy*W + dx; vertical padding comes from the zeroed halo lanes,
        # horizontal padding from the left/right lane masks.
        taps = []
        for dy in range(3):
            for dx in range(3):
                t = pad_ref[:, pl.ds(dy * W + dx, HW)]       # (GW, HW) f32
                if dx == 0:
                    t = jnp.where(left_ok, t, 0.0)
                elif dx == 2:
                    t = jnp.where(right_ok, t, 0.0)
                taps.append(t.astype(jnp.bfloat16))
        tap_slab = jnp.concatenate(taps, axis=0)             # (9*GW, HW) bf16
        out2 = jnp.maximum(
            jnp.dot(w2, tap_slab, preferred_element_type=jnp.float32) + b2,
            0.0)                                             # (GW, HW) f32

        if stride != 1:
            # TODO(synk): non-redundant strided conv2 (currently computes the
            # stride-1 result and subsamples it).
            out2 = out2.reshape(GW, H, W)[:, ::stride, ::stride]
            out2 = out2.reshape(GW, Ho * Wo)
            xb_s = xb.reshape(Cin, H, W)[:, ::stride, ::stride]
            xb_s = xb_s.reshape(Cin, Ho * Wo)
        else:
            xb_s = xb

        # ---- conv3 (1x1) + bn3, fused with conv-shortcut + bn, add, relu ----
        if conv_shortcut:
            act = jnp.concatenate(
                [out2.astype(jnp.bfloat16), xb_s.astype(jnp.bfloat16)], axis=0)
            y = jnp.dot(wcat, act, preferred_element_type=jnp.float32) + bcat
        else:
            y = (jnp.dot(wcat, out2.astype(jnp.bfloat16),
                         preferred_element_type=jnp.float32) + bcat + xb_s)
        o_ref[b] = jnp.maximum(y, 0.0).astype(o_ref.dtype)   # (Cout, Ho*Wo)


# ----------------------------------------------------------------------------
# Glue: BN folding, block-diagonal grouped weight, batch-block choice.
# ----------------------------------------------------------------------------
def fold_bn(gamma, beta, mean, var, eps=1e-5):
    scale = gamma / jnp.sqrt(var + eps)
    bias = beta - mean * scale
    return scale, bias


def grouped3x3_to_rows(w2, cardinality):
    """PyTorch grouped weight (GW, GW/card, 3, 3) -> (GW, 9*GW): column
    tap*GW + ci of row co holds w2[co, ci_local, ky, kx] (tap = ky*3 + kx)
    when ci is in co's group, else 0.  Vectorized, device-side."""
    cout, cg_in, kh, kw = w2.shape
    cg_out = cout // cardinality
    cin = cg_in * cardinality
    w_t = w2.reshape(cout, cg_in, kh * kw)                       # (co, ci_l, tap)
    ci = jnp.arange(cin)
    co = jnp.arange(cout)
    same = (ci[None, :] // cg_in) == (co[:, None] // cg_out)     # (co, ci)
    bd = w_t[:, ci % cg_in, :] * same[:, :, None].astype(w2.dtype)
    return jnp.transpose(bd, (0, 2, 1)).reshape(cout, kh * kw * cin)


def _images_per_step(n):
    # Amortize per-grid-step overhead, but keep >= 2 grid steps so both v7x
    # TensorCores get work ("parallel" batch axis).
    if n <= 2:
        return 1
    for b in (8, 4, 2):
        if n % b == 0 and n // b >= 2:
            return b
    return 1


# ----------------------------------------------------------------------------
# Block forward (single fused pallas_call, NCHW in / NCHW out)
# ----------------------------------------------------------------------------
def block_forward(x_nchw, params, cardinality, stride):
    expansion = 2
    x = x_nchw.astype(jnp.float32)
    N, Cin, H, W = x.shape
    GW = params["w1"].shape[0]                                   # group width
    Cout = expansion * GW
    Ho = (H - 1) // stride + 1
    Wo = (W - 1) // stride + 1
    conv_shortcut = (stride != 1) or (Cin != Cout)

    # Fold BN scales into weight rows (per out-channel); keep only biases.
    s1, b1 = fold_bn(params["bn1_g"], params["bn1_b"], params["bn1_m"], params["bn1_v"])
    s2, b2 = fold_bn(params["bn2_g"], params["bn2_b"], params["bn2_m"], params["bn2_v"])
    s3, b3 = fold_bn(params["bn3_g"], params["bn3_b"], params["bn3_m"], params["bn3_v"])

    w1f = (params["w1"].reshape(GW, Cin) * s1[:, None]).astype(jnp.bfloat16)
    w2f = (grouped3x3_to_rows(params["w2"], cardinality)
           * s2[:, None]).astype(jnp.bfloat16)                   # (GW, 9*GW)
    w3f = params["w3"].reshape(Cout, GW) * s3[:, None]
    if conv_shortcut:
        ss, bs = fold_bn(params["bns_g"], params["bns_b"],
                         params["bns_m"], params["bns_v"])
        wsf = params["ws"].reshape(Cout, Cin) * ss[:, None]
        wcat = jnp.concatenate([w3f, wsf], axis=1).astype(jnp.bfloat16)
        bcat = (b3 + bs).reshape(Cout, 1)
    else:
        wcat = w3f.astype(jnp.bfloat16)
        bcat = b3.reshape(Cout, 1)

    x_flat = x.reshape(N, Cin, H * W)                            # free reshape
    B = _images_per_step(N)
    assert N % B == 0

    kernel = functools.partial(_block_kernel, B=B, H=H, W=W, Ho=Ho, Wo=Wo,
                               stride=stride, conv_shortcut=conv_shortcut)

    out = pl.pallas_call(
        kernel,
        out_shape=jax.ShapeDtypeStruct((N, Cout, Ho * Wo), jnp.float32),
        grid=(N // B,),
        in_specs=[
            pl.BlockSpec((B, Cin, H * W), lambda n: (n, 0, 0)),  # image block
            pl.BlockSpec((GW, Cin), lambda n: (0, 0)),           # resident weights
            pl.BlockSpec((GW, 1), lambda n: (0, 0)),
            pl.BlockSpec((GW, 9 * GW), lambda n: (0, 0)),
            pl.BlockSpec((GW, 1), lambda n: (0, 0)),
            pl.BlockSpec(wcat.shape, lambda n: (0, 0)),
            pl.BlockSpec((Cout, 1), lambda n: (0, 0)),
        ],
        out_specs=pl.BlockSpec((B, Cout, Ho * Wo), lambda n: (n, 0, 0)),
        scratch_shapes=[pltpu.VMEM((GW, (H + 2) * W + 2), jnp.float32)],
        compiler_params=pltpu.CompilerParams(
            dimension_semantics=("parallel",)),
    )(x_flat, w1f, b1.reshape(GW, 1), w2f, b2.reshape(GW, 1), wcat, bcat)

    return out.reshape(N, Cout, Ho, Wo)                          # already NCHW


# ----------------------------------------------------------------------------
# Pure-JAX reference (lax convs, HIGHEST precision) for self-check
# ----------------------------------------------------------------------------
def block_forward_ref(x_nchw, params, cardinality, stride):
    dn = ("NCHW", "OIHW", "NCHW")
    eps = 1e-5
    hp = lax.Precision.HIGHEST

    def bn(y, g, b, m, v):
        g, b, m, v = (t.reshape(1, -1, 1, 1) for t in (g, b, m, v))
        return (y - m) / jnp.sqrt(v + eps) * g + b

    out = lax.conv_general_dilated(x_nchw, params["w1"], (1, 1), "VALID",
                                   dimension_numbers=dn, precision=hp)
    out = jax.nn.relu(bn(out, params["bn1_g"], params["bn1_b"], params["bn1_m"], params["bn1_v"]))
    out = lax.conv_general_dilated(out, params["w2"], (stride, stride), ((1, 1), (1, 1)),
                                   dimension_numbers=dn, feature_group_count=cardinality,
                                   precision=hp)
    out = jax.nn.relu(bn(out, params["bn2_g"], params["bn2_b"], params["bn2_m"], params["bn2_v"]))
    out = lax.conv_general_dilated(out, params["w3"], (1, 1), "VALID",
                                   dimension_numbers=dn, precision=hp)
    out = bn(out, params["bn3_g"], params["bn3_b"], params["bn3_m"], params["bn3_v"])

    Cout = params["w3"].shape[0]
    if stride != 1 or x_nchw.shape[1] != Cout:
        sc = lax.conv_general_dilated(x_nchw, params["ws"], (stride, stride), "VALID",
                                      dimension_numbers=dn, precision=hp)
        sc = bn(sc, params["bns_g"], params["bns_b"], params["bns_m"], params["bns_v"])
    else:
        sc = x_nchw[:, :, ::stride, ::stride]
    return jax.nn.relu(out + sc)


# ----------------------------------------------------------------------------
# Deterministic parameter construction (PyTorch layouts)
# ----------------------------------------------------------------------------
def make_params(key, in_planes, cardinality, bottleneck_width):
    GW = cardinality * bottleneck_width
    Cout = 2 * GW
    ks = jax.random.split(key, 8)

    def w(k, shape, s=0.1):
        return (s * jax.random.normal(k, shape)).astype(jnp.float32)

    def bn(k, c):
        k1, k2, k3, k4 = jax.random.split(k, 4)
        return (1.0 + 0.1 * jax.random.normal(k1, (c,)).astype(jnp.float32),   # gamma
                0.1 * jax.random.normal(k2, (c,)).astype(jnp.float32),         # beta
                0.1 * jax.random.normal(k3, (c,)).astype(jnp.float32),         # running mean
                1.0 + 0.2 * jax.random.uniform(k4, (c,)).astype(jnp.float32))  # running var

    p = {}
    p["w1"] = w(ks[0], (GW, in_planes, 1, 1))
    p["bn1_g"], p["bn1_b"], p["bn1_m"], p["bn1_v"] = bn(ks[1], GW)
    p["w2"] = w(ks[2], (GW, GW // cardinality, 3, 3))
    p["bn2_g"], p["bn2_b"], p["bn2_m"], p["bn2_v"] = bn(ks[3], GW)
    p["w3"] = w(ks[4], (Cout, GW, 1, 1))
    p["bn3_g"], p["bn3_b"], p["bn3_m"], p["bn3_v"] = bn(ks[5], Cout)
    p["ws"] = w(ks[6], (Cout, in_planes, 1, 1))
    p["bns_g"], p["bns_b"], p["bns_m"], p["bns_v"] = bn(ks[7], Cout)
    return p


# ----------------------------------------------------------------------------
if __name__ == "__main__":
    # Small ResNeXt block config: in_planes=8, cardinality=4, bottleneck_width=4
    # -> group_width=16, output channels=32, stride=1 (conv shortcut active).
    in_planes, cardinality, bottleneck_width, stride = 8, 4, 4, 1

    key = jax.random.PRNGKey(0)
    kx, kp = jax.random.split(key)
    x = jax.random.normal(kx, (2, in_planes, 16, 16), dtype=jnp.float32)  # NCHW
    params = make_params(kp, in_planes, cardinality, bottleneck_width)

    fwd = jax.jit(lambda xx, pp: block_forward(xx, pp, cardinality, stride))
    out = jax.block_until_ready(fwd(x, params))

    ref = jax.block_until_ready(block_forward_ref(x, params, cardinality, stride))
    assert out.shape == ref.shape == (2, 2 * cardinality * bottleneck_width, 16, 16)
    # Looser tolerance: kernel uses bf16 MXU operands (f32 accumulate);
    # reference uses HIGHEST-precision convs.
    max_err = jnp.max(jnp.abs(out - ref))
    assert jnp.allclose(out, ref, rtol=2e-2, atol=2e-2), f"max abs err {max_err}"

    print("KERNEL_OK")
</pallas_src>

<mosaic_0001>
module attributes {stable_mosaic.version = 11 : i64} {
  func.func @_block_kernel(%arg0: i32, %arg1: memref<1x8x256xf32, #tpu.memory_space<vmem>>, %arg2: memref<16x8xbf16, #tpu.memory_space<vmem>>, %arg3: memref<16x1xf32, #tpu.memory_space<vmem>>, %arg4: memref<16x144xbf16, #tpu.memory_space<vmem>>, %arg5: memref<16x1xf32, #tpu.memory_space<vmem>>, %arg6: memref<32x24xbf16, #tpu.memory_space<vmem>>, %arg7: memref<32x1xf32, #tpu.memory_space<vmem>>, %arg8: memref<1x32x256xf32, #tpu.memory_space<vmem>>, %arg9: memref<16x290xf32, #tpu.memory_space<vmem>>) attributes {dimension_semantics = [#tpu.dimension_semantics<parallel>], iteration_bounds = array<i64: 2>, scalar_prefetch = 0 : i64, scratch_operands = 1 : i64, tpu.core_type = #tpu.core_type<tc>, window_params = [{transform_indices = @transform_0, window_bounds = array<i64: 1, 8, 256>}, {pipeline_mode = #tpu.pipeline_mode<synchronous>, transform_indices = @transform_1, window_bounds = array<i64: 16, 8>}, {pipeline_mode = #tpu.pipeline_mode<synchronous>, transform_indices = @transform_2, window_bounds = array<i64: 16, 1>}, {pipeline_mode = #tpu.pipeline_mode<synchronous>, transform_indices = @transform_3, window_bounds = array<i64: 16, 144>}, {pipeline_mode = #tpu.pipeline_mode<synchronous>, transform_indices = @transform_4, window_bounds = array<i64: 16, 1>}, {pipeline_mode = #tpu.pipeline_mode<synchronous>, transform_indices = @transform_5, window_bounds = array<i64: 32, 24>}, {pipeline_mode = #tpu.pipeline_mode<synchronous>, transform_indices = @transform_6, window_bounds = array<i64: 32, 1>}, {transform_indices = @transform_7, window_bounds = array<i64: 1, 32, 256>}]} {
    %c0 = arith.constant 0 : index
    %c0_0 = arith.constant 0 : index
    %0 = vector.load %arg2[%c0, %c0_0] : memref<16x8xbf16, #tpu.memory_space<vmem>>, vector<16x8xbf16>
    %c0_1 = arith.constant 0 : index
    %c0_2 = arith.constant 0 : index
    %1 = vector.load %arg4[%c0_1, %c0_2] : memref<16x144xbf16, #tpu.memory_space<vmem>>, vector<16x144xbf16>
    %c0_3 = arith.constant 0 : index
    %c0_4 = arith.constant 0 : index
    %2 = vector.load %arg6[%c0_3, %c0_4] : memref<32x24xbf16, #tpu.memory_space<vmem>>, vector<32x24xbf16>
    %c0_5 = arith.constant 0 : index
    %c0_6 = arith.constant 0 : index
    %3 = vector.load %arg3[%c0_5, %c0_6] : memref<16x1xf32, #tpu.memory_space<vmem>>, vector<16x1xf32>
    %c0_7 = arith.constant 0 : index
    %c0_8 = arith.constant 0 : index
    %4 = vector.load %arg5[%c0_7, %c0_8] : memref<16x1xf32, #tpu.memory_space<vmem>>, vector<16x1xf32>
    %c0_9 = arith.constant 0 : index
    %c0_10 = arith.constant 0 : index
    %5 = vector.load %arg7[%c0_9, %c0_10] : memref<32x1xf32, #tpu.memory_space<vmem>>, vector<32x1xf32>
    %6 = tpu.iota {dimensions = array<i32: 1>} : vector<1x256xi32>
    %c16_i32 = arith.constant 16 : i32
    %c0_i32 = arith.constant 0 : i32
    %7 = arith.cmpi eq, %c16_i32, %c0_i32 : i32
    %c1_i32 = arith.constant 1 : i32
    %8 = arith.select %7, %c1_i32, %c16_i32 : i32
    %9 = vector.broadcast %8 : i32 to vector<1x256xi32>
    %10 = arith.remsi %6, %9 : vector<1x256xi32>
    %c0_i32_11 = arith.constant 0 : i32
    %11 = vector.broadcast %c0_i32_11 : i32 to vector<1x256xi32>
    %12 = arith.cmpi ne, %10, %11 : vector<1x256xi32>
    %c0_i32_12 = arith.constant 0 : i32
    %13 = vector.broadcast %c0_i32_12 : i32 to vector<1x256xi32>
    %14 = arith.cmpi slt, %10, %13 : vector<1x256xi32>
    %c0_i32_13 = arith.constant 0 : i32
    %15 = arith.cmpi slt, %8, %c0_i32_13 : i32
    %16 = vector.broadcast %15 : i1 to vector<1x256xi1>
    %17 = vector.broadcast %16 : vector<1x256xi1> to vector<1x256xi1>
    %18 = arith.xori %14, %17 : vector<1x256xi1>
    %19 = arith.andi %18, %12 : vector<1x256xi1>
    %20 = vector.broadcast %8 : i32 to vector<1x256xi32>
    %21 = arith.addi %10, %20 : vector<1x256xi32>
    %22 = arith.select %19, %21, %10 : vector<1x256xi1>, vector<1x256xi32>
    %c0_i32_14 = arith.constant 0 : i32
    %23 = vector.broadcast %c0_i32_14 : i32 to vector<1x256xi32>
    %24 = arith.cmpi ne, %22, %23 : vector<1x256xi32>
    %c15_i32 = arith.constant 15 : i32
    %25 = vector.broadcast %c15_i32 : i32 to vector<1x256xi32>
    %26 = arith.cmpi ne, %22, %25 : vector<1x256xi32>
    %cst = arith.constant 0.000000e+00 : f32
    %27 = vector.broadcast %cst : f32 to vector<16x17xf32>
    %c0_15 = arith.constant 0 : index
    %c0_16 = arith.constant 0 : index
    %c0_17 = arith.constant 0 : index
    %28 = vector.load %arg1[%c0_15, %c0_16, %c0_17] : memref<1x8x256xf32, #tpu.memory_space<vmem>>, vector<1x8x256xf32>
    %29 = vector.shape_cast %28 : vector<1x8x256xf32> to vector<8x256xf32>
    %30 = arith.truncf %29 : vector<8x256xf32> to vector<8x256xbf16>
    %cst_18 = arith.constant dense<0.000000e+00> : vector<16x256xf32>
    %31 = tpu.matmul %0, %30, %cst_18 {dimension_numbers = #tpu.dot_dimension_numbers<[1], [0], [0], [1], [0, 0, 1, 1], [], []>} : vector<16x8xbf16>, vector<8x256xbf16>, vector<16x256xf32> -> vector<16x256xf32>
    %32 = vector.broadcast %3 : vector<16x1xf32> to vector<16x256xf32>
    %33 = arith.addf %31, %32 : vector<16x256xf32>
    %cst_19 = arith.constant 0.000000e+00 : f32
    %34 = vector.broadcast %cst_19 : f32 to vector<16x256xf32>
    %35 = arith.maximumf %33, %34 : vector<16x256xf32>
    %c0_20 = arith.constant 0 : index
    %c0_21 = arith.constant 0 : index
    %36 = vector.load %arg9[%c0_20, %c0_21] : memref<16x290xf32, #tpu.memory_space<vmem>>, vector<16x17xf32>
    tpu.vector_store %arg9[%c0_20, %c0_21], %27 {strides = array<i32>} : memref<16x290xf32, #tpu.memory_space<vmem>>, vector<16x17xf32>,
    %c0_22 = arith.constant 0 : index
    %c273 = arith.constant 273 : index
    %37 = vector.load %arg9[%c0_22, %c273] : memref<16x290xf32, #tpu.memory_space<vmem>>, vector<16x17xf32>
    tpu.vector_store %arg9[%c0_22, %c273], %27 {strides = array<i32>} : memref<16x290xf32, #tpu.memory_space<vmem>>, vector<16x17xf32>,
    %c0_23 = arith.constant 0 : index
    %c17 = arith.constant 17 : index
    %38 = vector.load %arg9[%c0_23, %c17] : memref<16x290xf32, #tpu.memory_space<vmem>>, vector<16x256xf32>
    tpu.vector_store %arg9[%c0_23, %c17], %35 {strides = array<i32>} : memref<16x290xf32, #tpu.memory_space<vmem>>, vector<16x256xf32>,
    %c0_24 = arith.constant 0 : index
    %c0_25 = arith.constant 0 : index
    %39 = vector.load %arg9[%c0_24, %c0_25] : memref<16x290xf32, #tpu.memory_space<vmem>>, vector<16x256xf32>
    %cst_26 = arith.constant 0.000000e+00 : f32
    %40 = vector.shape_cast %24 : vector<1x256xi1> to vector<1x256xi1>
    %41 = vector.broadcast %40 : vector<1x256xi1> to vector<16x256xi1>
    %42 = vector.broadcast %cst_26 : f32 to vector<16x256xf32>
    %43 = arith.select %41, %39, %42 : vector<16x256xi1>, vector<16x256xf32>
    %44 = arith.truncf %43 : vector<16x256xf32> to vector<16x256xbf16>
    %c0_27 = arith.constant 0 : index
    %c1 = arith.constant 1 : index
    %45 = vector.load %arg9[%c0_27, %c1] : memref<16x290xf32, #tpu.memory_space<vmem>>, vector<16x256xf32>
    %46 = arith.truncf %45 : vector<16x256xf32> to vector<16x256xbf16>
    %c0_28 = arith.constant 0 : index
    %c2 = arith.constant 2 : index
    %47 = vector.load %arg9[%c0_28, %c2] : memref<16x290xf32, #tpu.memory_space<vmem>>, vector<16x256xf32>
    %cst_29 = arith.constant 0.000000e+00 : f32
    %48 = vector.shape_cast %26 : vector<1x256xi1> to vector<1x256xi1>
    %49 = vector.broadcast %48 : vector<1x256xi1> to vector<16x256xi1>
    %50 = vector.broadcast %cst_29 : f32 to vector<16x256xf32>
    %51 = arith.select %49, %47, %50 : vector<16x256xi1>, vector<16x256xf32>
    %52 = arith.truncf %51 : vector<16x256xf32> to vector<16x256xbf16>
    %c0_30 = arith.constant 0 : index
    %c16 = arith.constant 16 : index
    %53 = vector.load %arg9[%c0_30, %c16] : memref<16x290xf32, #tpu.memory_space<vmem>>, vector<16x256xf32>
    %cst_31 = arith.constant 0.000000e+00 : f32
    %54 = vector.shape_cast %24 : vector<1x256xi1> to vector<1x256xi1>
    %55 = vector.broadcast %54 : vector<1x256xi1> to vector<16x256xi1>
    %56 = vector.broadcast %cst_31 : f32 to vector<16x256xf32>
    %57 = arith.select %55, %53, %56 : vector<16x256xi1>, vector<16x256xf32>
    %58 = arith.truncf %57 : vector<16x256xf32> to vector<16x256xbf16>
    %c0_32 = arith.constant 0 : index
    %c17_33 = arith.constant 17 : index
    %59 = vector.load %arg9[%c0_32, %c17_33] : memref<16x290xf32, #tpu.memory_space<vmem>>, vector<16x256xf32>
    %60 = arith.truncf %59 : vector<16x256xf32> to vector<16x256xbf16>
    %c0_34 = arith.constant 0 : index
    %c18 = arith.constant 18 : index
    %61 = vector.load %arg9[%c0_34, %c18] : memref<16x290xf32, #tpu.memory_space<vmem>>, vector<16x256xf32>
    %cst_35 = arith.constant 0.000000e+00 : f32
    %62 = vector.shape_cast %26 : vector<1x256xi1> to vector<1x256xi1>
    %63 = vector.broadcast %62 : vector<1x256xi1> to vector<16x256xi1>
    %64 = vector.broadcast %cst_35 : f32 to vector<16x256xf32>
    %65 = arith.select %63, %61, %64 : vector<16x256xi1>, vector<16x256xf32>
    %66 = arith.truncf %65 : vector<16x256xf32> to vector<16x256xbf16>
    %c0_36 = arith.constant 0 : index
    %c32 = arith.constant 32 : index
    %67 = vector.load %arg9[%c0_36, %c32] : memref<16x290xf32, #tpu.memory_space<vmem>>, vector<16x256xf32>
    %cst_37 = arith.constant 0.000000e+00 : f32
    %68 = vector.shape_cast %24 : vector<1x256xi1> to vector<1x256xi1>
    %69 = vector.broadcast %68 : vector<1x256xi1> to vector<16x256xi1>
    %70 = vector.broadcast %cst_37 : f32 to vector<16x256xf32>
    %71 = arith.select %69, %67, %70 : vector<16x256xi1>, vector<16x256xf32>
    %72 = arith.truncf %71 : vector<16x256xf32> to vector<16x256xbf16>
    %c0_38 = arith.constant 0 : index
    %c33 = arith.constant 33 : index
    %73 = vector.load %arg9[%c0_38, %c33] : memref<16x290xf32, #tpu.memory_space<vmem>>, vector<16x256xf32>
    %74 = arith.truncf %73 : vector<16x256xf32> to vector<16x256xbf16>
    %c0_39 = arith.constant 0 : index
    %c34 = arith.constant 34 : index
    %75 = vector.load %arg9[%c0_39, %c34] : memref<16x290xf32, #tpu.memory_space<vmem>>, vector<16x256xf32>
    %cst_40 = arith.constant 0.000000e+00 : f32
    %76 = vector.shape_cast %26 : vector<1x256xi1> to vector<1x256xi1>
    %77 = vector.broadcast %76 : vector<1x256xi1> to vector<16x256xi1>
    %78 = vector.broadcast %cst_40 : f32 to vector<16x256xf32>
    %79 = arith.select %77, %75, %78 : vector<16x256xi1>, vector<16x256xf32>
    %80 = arith.truncf %79 : vector<16x256xf32> to vector<16x256xbf16>
    %81 = tpu.concatenate %44, %46, %52, %58, %60, %66, %72, %74, %80 in 0 : vector<16x256xbf16>, vector<16x256xbf16>, vector<16x256xbf16>, vector<16x256xbf16>, vector<16x256xbf16>, vector<16x256xbf16>, vector<16x256xbf16>, vector<16x256xbf16>, vector<16x256xbf16> -> vector<144x256xbf16>
    %cst_41 = arith.constant dense<0.000000e+00> : vector<16x256xf32>
    %82 = tpu.matmul %1, %81, %cst_41 {dimension_numbers = #tpu.dot_dimension_numbers<[1], [0], [0], [1], [0, 0, 1, 1], [], []>} : vector<16x144xbf16>, vector<144x256xbf16>, vector<16x256xf32> -> vector<16x256xf32>
    %83 = vector.broadcast %4 : vector<16x1xf32> to vector<16x256xf32>
    %84 = arith.addf %82, %83 : vector<16x256xf32>
    %cst_42 = arith.constant 0.000000e+00 : f32
    %85 = vector.broadcast %cst_42 : f32 to vector<16x256xf32>
    %86 = arith.maximumf %84, %85 : vector<16x256xf32>
    %87 = arith.truncf %86 : vector<16x256xf32> to vector<16x256xbf16>
    %88 = arith.truncf %29 : vector<8x256xf32> to vector<8x256xbf16>
    %89 = tpu.concatenate %87, %88 in 0 : vector<16x256xbf16>, vector<8x256xbf16> -> vector<24x256xbf16>
    %cst_43 = arith.constant dense<0.000000e+00> : vector<32x256xf32>
    %90 = tpu.matmul %2, %89, %cst_43 {dimension_numbers = #tpu.dot_dimension_numbers<[1], [0], [0], [1], [0, 0, 1, 1], [], []>} : vector<32x24xbf16>, vector<24x256xbf16>, vector<32x256xf32> -> vector<32x256xf32>
    %91 = vector.broadcast %5 : vector<32x1xf32> to vector<32x256xf32>
    %92 = arith.addf %90, %91 : vector<32x256xf32>
    %cst_44 = arith.constant 0.000000e+00 : f32
    %93 = vector.broadcast %cst_44 : f32 to vector<32x256xf32>
    %94 = arith.maximumf %92, %93 : vector<32x256xf32>
    %c0_45 = arith.constant 0 : index
    %c0_46 = arith.constant 0 : index
    %c0_47 = arith.constant 0 : index
    %95 = vector.load %arg8[%c0_45, %c0_46, %c0_47] : memref<1x32x256xf32, #tpu.memory_space<vmem>>, vector<1x32x256xf32>
    %96 = vector.shape_cast %95 : vector<1x32x256xf32> to vector<32x256xf32>
    %97 = vector.shape_cast %94 : vector<32x256xf32> to vector<1x32x256xf32>
    tpu.vector_store %arg8[%c0_45, %c0_46, %c0_47], %97 {strides = array<i32>} : memref<1x32x256xf32, #tpu.memory_space<vmem>>, vector<1x32x256xf32>,
    return
  }
  func.func @transform_0(%arg0: i32) -> (i32, i32, i32) {
    %c0_i32 = arith.constant 0 : i32
    %c0_i32_0 = arith.constant 0 : i32
    %c0_i32_1 = arith.constant 0 : i32
    return %arg0, %c0_i32, %c0_i32_0 : i32, i32, i32
  }
  func.func @transform_1(%arg0: i32) -> (i32, i32) {
    %c0_i32 = arith.constant 0 : i32
    %c0_i32_0 = arith.constant 0 : i32
    %c0_i32_1 = arith.constant 0 : i32
    return %c0_i32, %c0_i32_0 : i32, i32
  }
  func.func @transform_2(%arg0: i32) -> (i32, i32) {
    %c0_i32 = arith.constant 0 : i32
    %c0_i32_0 = arith.constant 0 : i32
    %c0_i32_1 = arith.constant 0 : i32
    return %c0_i32, %c0_i32_0 : i32, i32
  }
  func.func @transform_3(%arg0: i32) -> (i32, i32) {
    %c0_i32 = arith.constant 0 : i32
    %c0_i32_0 = arith.constant 0 : i32
    %c0_i32_1 = arith.constant 0 : i32
    return %c0_i32, %c0_i32_0 : i32, i32
  }
  func.func @transform_4(%arg0: i32) -> (i32, i32) {
    %c0_i32 = arith.constant 0 : i32
    %c0_i32_0 = arith.constant 0 : i32
    %c0_i32_1 = arith.constant 0 : i32
    return %c0_i32, %c0_i32_0 : i32, i32
  }
  func.func @transform_5(%arg0: i32) -> (i32, i32) {
    %c0_i32 = arith.constant 0 : i32
    %c0_i32_0 = arith.constant 0 : i32
    %c0_i32_1 = arith.constant 0 : i32
    return %c0_i32, %c0_i32_0 : i32, i32
  }
  func.func @transform_6(%arg0: i32) -> (i32, i32) {
    %c0_i32 = arith.constant 0 : i32
    %c0_i32_0 = arith.constant 0 : i32
    %c0_i32_1 = arith.constant 0 : i32
    return %c0_i32, %c0_i32_0 : i32, i32
  }
  func.func @transform_7(%arg0: i32) -> (i32, i32, i32) {
    %c0_i32 = arith.constant 0 : i32
    %c0_i32_0 = arith.constant 0 : i32
    %c0_i32_1 = arith.constant 0 : i32
    return %arg0, %c0_i32, %c0_i32_0 : i32, i32, i32
  }
}

</mosaic_0001>

<bundles_post_ra>
// kernel: _lambda_.1
= control target key start
LH: loop header
LB: loop body
LE: loop exit
PB: predicated region body
PF: predicated region fallthrough
CT: control target
= control target key end

     0   :  { %s1091_s24 = smov 0   ;;  %s1243_s0 = inlined_call_operand.vmem [shape: f32[2,8,256], index: 0, kind: input, shape index: {}]   ;;  %s1244_s1 = inlined_call_operand.vmem [shape: bf16[16,8], index: 1, kind: input, shape index: {}]   ;;  %s1245_s2 = inlined_call_operand.vmem [shape: f32[16,1], index: 2, kind: input, shape index: {}]   ;;  %s1246_s3 = inlined_call_operand.vmem [shape: bf16[16,144], index: 3, kind: input, shape index: {}]   ;;  %s1247_s4 = inlined_call_operand.vmem [shape: f32[16,1], index: 4, kind: input, shape index: {}]   ;;  %s1248_s5 = inlined_call_operand.vmem [shape: bf16[32,24], index: 5, kind: input, shape index: {}]   ;;  %s1249_s6 = inlined_call_operand.vmem [shape: f32[32,1], index: 6, kind: input, shape index: {}]   ;;  %s1250_s7 = inlined_call_operand.vmem [shape: f32[2,32,256], index: 7, kind: output, shape index: {}]  }
   0x1 LB: > { %s870_s25 = sadd.s32 4294967295, %s1038_s24   ;;  %p874_p0 = scmp.ge.s32.totalorder %s1038_s24, 1  ;;  %s1038_s24 = sphi %s1091_s24, %s17_s24  }
   0x2   : > { %p237_p1 = scmp.lt.s32.totalorder %s1038_s24, 3 }
   0x4   : > { %p238_p2 = pnand %p874_p0, %p237_p1 }
   0x5   : > { %p269_p3 = scmp.lt.s32.totalorder (!%p238_p2), %s870_s25, 1  ;;  %s1042_s13 = smov (!%p238_p2), 17  }
   0x6   : > { %241 = sbr.rel (%p238_p2) target bundleno = 937 (0x3a9), region = 48  ;;  %s1043_s14 = smov (!%p238_p2), 110  }
   0x7   : > { %s1044_s15 = smov (!%p238_p2), 96   ;;  %s1045_s16 = smov (!%p238_p2), 95  }
   0x8   : > { %s1046_s17 = smov (!%p238_p2), 111   ;;  %s1047_s18 = smov (!%p238_p2), 112  }
   0x9   : > { %s1048_s19 = smov (!%p238_p2), 126   ;;  %s1049_s20 = smov (!%p238_p2), 127  }
   0xa   : > { %s1050_s23 = smov (!%p238_p2), 94  }
   0xb   : > { %v1040_v0 = vmov 0   ;;  %v288_v1 = vld [vmem:[%s1245_s2] sm:$0xff]  ;;  %v289_v2 = vld [vmem:[%s1245_s2 + $0x8] sm:$0xff]  ;;  %s1262_s25 = smov (!%p269_p3, %s870_s25), 1  ;;  %vm350_vm0 = vcmask 1043456   ;;  %vm346_vm1 = vcmask 64512   ;;  %v296_v47 = vlaneseq }
   0xc   : > { %389 = vmatprep.mubr.bf16.mxu0 %v1040_v0  ;;  %949 = vset.pattern.permute.xlu0 %v1040_v0  ;;  %s928_s30 = sshll.u32 %s1262_s25, 4  ;;  %v1026_v8 = vld [vmem:[%s1244_s1] sm:$0xff]   ;;  %vm404_vm2 = vcmask 138240   ;;  %v1041_v9 = vmov 0.0   ;;  %vm407_vm3 = vcmask 277640   ;;  %vm430_vm4 = vcmask 1047688  }
   0xd   : > { %333 = vperm.xlu0 %949, %v288_v1   ;;  %1025 = vset.pattern.permute.xlu1 %v1040_v0  ;;  %s273_s10 = scalar_lea.vmem %s1243_s0, %s928_s30  ;;  %405 = vst.msk [vmem:[#allocation2] sm:$0xff] %vm404_vm2, %v1041_v9  ;;  %406 = vst.msk [vmem:[#allocation2 + $0x18] sm:$0xff] %vm404_vm2, %v1041_v9  ;;  %v1029_v40 = vld [vmem:[%s1246_s3 + $0x4] ss:$8 sps:$4 sm:$0xff]   ;;  %vm656_vm5 = vcmask 130048   ;;  %v294_v44 = vld [vmem:[%s1249_s6 + $0x10] sm:$0xff] }
   0xe   : > { %v328_v3 = vld [vmem:[%s273_s10 + $0x8] sm:$0xff]  ;;  %v327_v4 = vld [vmem:[%s273_s10] sm:$0xff]  ;;  %408 = vst.msk [vmem:[#allocation2 + $0x10] sm:$0xff] %vm407_vm3, %v1041_v9  ;;  %409 = vst.msk [vmem:[#allocation2 + $0x28] sm:$0xff] %vm407_vm3, %v1041_v9  ;;  %920 = vmatprep.mubr.msk.bf16.mxu1 %vm656_vm5, %v1029_v40  ;;  %v297_v48 = vand.u32 127, %v296_v47  ;;  %vm559_vm6 = vcmask 785408  }
   0xf   : > { %v330_v5 = vpack.c.bf16 %v328_v3, %v328_v3  ;;  %v329_v6 = vpack.c.bf16 %v327_v4, %v327_v4  ;;  %v290_v41 = vld [vmem:[%s1247_s4] sm:$0xff]  ;;  %v291_v43 = vld [vmem:[%s1247_s4 + $0x8] sm:$0xff]  ;;  %v295_v46 = vld [vmem:[%s1249_s6 + $0x18] sm:$0xff]  ;;  %vm632_vm7 = vcmask 777216   ;;  %vm532_vm11 = vcmask 900096   ;;  %s929_s21 = sshll.u32 %s1262_s25, 6 }
  0x10   : > { %v292_v42 = vld [vmem:[%s1249_s6] sm:$0xff]  ;;  %v293_v45 = vld [vmem:[%s1249_s6 + $0x8] sm:$0xff]  ;;  %v298_v51 = vadd.s32 128, %v297_v48  ;;  %v303_v57 = vand.u32 15, %v297_v48  ;;  %vm478_vm3 = vcmask 1031168   ;;  %vm586_vm5 = vcmask 769024   ;;  %s1230_s26 = scalar_lea.vmem %s1250_s7, %s929_s21 }
  0x11   : > { %338 = vperm.xlu0 %949, %v289_v2   ;;  %880 = vmatprep.subr.msk.bf16.mxu0 %vm350_vm0, %v330_v5  ;;  %v352_v7 = vsel %vm350_vm0, %v329_v6, 0 }
  0x12   : > { %372 = vmatpush1.bf16.msra.mxu0 %v352_v7  ;;  %v310_v54 = vand.u32 15, %v298_v51  ;;  %vm1156_vm9 = vcmp.ne.s32.totalorder %v303_v57, 0  ;;  %vm325_vm14 = vcmp.ne.s32.totalorder %v303_v57, 15 }
  0x13   : > { %923 = vmatprep.subr.msk.bf16.mxu0 %vm350_vm0, %v330_v5  ;;  %vm1173_vm13 = vmpackc.low %vm1156_vm9, %vm1156_vm9 }
  0x14   : > { %vm324_vm8 = vcmp.ne.s32.totalorder %v310_v54, 0  ;;  %vm326_vm12 = vcmp.ne.s32.totalorder %v310_v54, 15  ;;  %vm1188_vm0 = vmpackc.low %vm325_vm14, %vm325_vm14 }
  0x15   : > { %881 = vmatmul.mubr.msk.bf16.vlgmr.msra.gmra.mxu0 %vm346_vm1, %v1026_v8  ;;  %vm1161_vm10 = vmpackc.low %vm324_vm8, %vm324_vm8  ;;  %vm621_vm1 = vcmask 908288  }
  0x16   : > { %759 = vmatpush1.bf16.msra.mxu0 %v352_v7  ;;  %778 = vmatprep.mubr.bf16.mxu0 %v1040_v0  ;;  %vm1178_vm15 = vmpackc.low %vm326_vm12, %vm326_vm12 }
  0x88   : > { %v334_v10 = vpop.permute.xlu0 %333 }
  0x8c   : > { %v339_v16 = vpop.permute.xlu0 %338 }
  0xd5   : > { %v391_v11 = vpop.f32.mrf.mxu0 }
  0xd6   : > { %v392_v12 = vadd.f32 %v391_v11, %v334_v10 }
  0xd7   : > { %v393_v13 = vpop.f32.mrf.mxu0 }
  0xd8   : > { %v400_v14 = vmax.f32 %v392_v12, 0.0  ;;  %v394_v15 = vadd.f32 %v393_v13, %v334_v10 }
  0xd9   : > { %v395_v17 = vpop.f32.mrf.mxu0 }
  0xda   : > { %v396_v18 = vadd.f32 %v395_v17, %v339_v16  ;;  %414 = vrot.lane.b32.xlu1 %v400_v14, %s1042_s13  ;;  %v401_v20 = vmax.f32 %v394_v15, 0.0 }
  0xdb   : > { %v397_v19 = vpop.f32.mrf.mxu0 }
  0xdc   : > { %v402_v21 = vmax.f32 %v396_v18, 0.0  ;;  %v398_v22 = vadd.f32 %v397_v19, %v339_v16 }
  0xde   : > { %418 = vrot.lane.b32.xlu0 %v402_v21, %s1042_s13  ;;  %416 = vrot.lane.b32.xlu1 %v401_v20, %s1042_s13  ;;  %v403_v23 = vmax.f32 %v398_v22, 0.0 }
  0xe2   : > { %420 = vrot.lane.b32.xlu1 %v403_v23, %s1042_s13 }
 0x14c   : > { %v415_v24 = vpop.permute.xlu1 %414 }
 0x14d   : > { %431 = vst.msk [vmem:[#allocation2] sm:$0xff] %vm430_vm4, %v415_v24 }
 0x150   : > { %v419_v25 = vpop.permute.xlu0 %418  ;;  %v417_v26 = vpop.permute.xlu1 %416 }
 0x151   : > { %434 = vst.msk [vmem:[#allocation2 + $0x18] sm:$0xff] %vm430_vm4, %v419_v25  ;;  %v422_v27 = vsel %vm404_vm2, %v415_v24, %v417_v26  ;;  %vm610_vm4 = vcmask 1039360  }
 0x152   : > { %433 = vst.msk [vmem:[#allocation2 + $0x10] sm:$0xff] %vm404_vm2, %v417_v26 }
 0x154   : > { %v421_v28 = vpop.permute.xlu1 %420  ;;  %v437_v33 = vld [vmem:[#allocation2] sm:$0xff] }
 0x155   : > { %v423_v29 = vsel %vm404_vm2, %v419_v25, %v421_v28  ;;  %436 = vst.msk [vmem:[#allocation2 + $0x28] sm:$0xff] %vm404_vm2, %v421_v28  ;;  %vm505_vm2 = vcmask 916480  }
 0x156   : > { %v1127_v39 = vpack.c.bf16 %v423_v29, %v422_v27 }
 0x158   : > { %v439_v32 = vld [vmem:[#allocation2 + $0x18] sm:$0xff] }
 0x159   : > { %v451_v30 = vld [vmem:[#allocation2 + $0x10] sm:$0xff]  ;;  %v1124_v34 = vpack.c.bf16 %v439_v32, %v437_v33  ;;  %v960_v35 = vpack.i.bf16 %v439_v32, %v437_v33 }
 0x15a   : > { %v955_v31 = vpack.i.bf16 %v451_v30, %v422_v27 }
 0x15c   : > { %956 = vrot.lane.b32.xlu0 %v955_v31, %s1043_s14  ;;  %951 = vrot.lane.b32.xlu1 %v955_v31, %s1044_s15  ;;  %v452_v36 = vld [vmem:[#allocation2 + $0x28] sm:$0xff] }
 0x15d   : > { %v970_v37 = vpack.i.bf16 %v452_v36, %v423_v29  ;;  %v455_v38 = vpack.c.bf16 %v452_v36, %v451_v30 }
 0x160   : > { %626 = vrot.lane.b32.xlu0 %v1124_v34, %s1045_s16  ;;  %961 = vrot.lane.b32.xlu1 %v960_v35, %s1044_s15 }
 0x164   : > { %971 = vrot.lane.b32.xlu1 %v970_v37, %s1043_s14  ;;  %966 = vrot.lane.b32.xlu0 %v970_v37, %s1044_s15 }
 0x168   : > { %630 = vrot.lane.b32.xlu1 %v455_v38, %s1045_s16  ;;  %628 = vrot.lane.b32.xlu0 %v1127_v39, %s1045_s16 }
 0x16c   : > { %615 = vrot.lane.b32.xlu1 %v1124_v34, %s1046_s17  ;;  %976 = vrot.lane.b32.xlu0 %v960_v35, %s1043_s14 }
 0x170   : > { %986 = vrot.lane.b32.xlu1 %v970_v37, %s1047_s18  ;;  %619 = vrot.lane.b32.xlu0 %v455_v38, %s1046_s17 }
 0x174   : > { %617 = vrot.lane.b32.xlu1 %v1127_v39, %s1046_s17  ;;  %981 = vrot.lane.b32.xlu0 %v955_v31, %s1047_s18 }
 0x178   : > { %996 = vrot.lane.b32.xlu1 %v955_v31, %s1048_s19  ;;  %991 = vrot.lane.b32.xlu0 %v960_v35, %s1047_s18 }
 0x17c   : > { %1006 = vrot.lane.b32.xlu1 %v960_v35, %s1048_s19  ;;  %1001 = vrot.lane.b32.xlu0 %v970_v37, %s1048_s19 }
 0x180   : > { %608 = vrot.lane.b32.xlu1 %v455_v38, %s1049_s20  ;;  %606 = vrot.lane.b32.xlu0 %v1127_v39, %s1049_s20 }
 0x184   : > { %1011 = vrot.lane.b32.xlu1 %v955_v31, %s1050_s23  ;;  %604 = vrot.lane.b32.xlu0 %v1124_v34, %s1049_s20  ;;  %v1030_v31 = vld [vmem:[%s1248_s5] sm:$0xff]  }
 0x188   : > { %1021 = vrot.lane.b32.xlu1 %v960_v35, %s1050_s23  ;;  %1016 = vrot.lane.b32.xlu0 %v970_v37, %s1050_s23 }
 0x18c   : > { %639 = vperm.xlu0 %949, %v290_v41   ;;  %644 = vperm.xlu1 %1025, %v291_v43  }
 0x190   : > { %711 = vperm.xlu0 %949, %v292_v42   ;;  %716 = vperm.xlu1 %1025, %v293_v45  }
 0x194   : > { %721 = vperm.xlu0 %949, %v294_v44   ;;  %726 = vperm.xlu1 %1025, %v295_v46  }
 0x1ce   : > { %v957_v49 = vpop.permute.xlu0 %956  ;;  %v952_v50 = vpop.permute.xlu1 %951 }
 0x1cf   : > { %v954_v58 = vunpack.i.h.bf16 %v952_v50  ;;  %v953_v59 = vunpack.i.l.bf16 %v952_v50  ;;  %v959_v2 = vunpack.i.h.bf16 %v957_v49  ;;  %v958_v8 = vunpack.i.l.bf16 %v957_v49 }
 0x1d1   : > { %v561_v9 = vsel %vm559_vm6, %v953_v59, %v954_v58  ;;  %v534_v20 = vsel %vm532_vm11, %v958_v8, %v959_v2 }
 0x1d2   : > { %v627_v52 = vpop.permute.xlu0 %626  ;;  %v962_v53 = vpop.permute.xlu1 %961 }
 0x1d3   : > { %v964_v3 = vunpack.i.h.bf16 %v962_v53  ;;  %v963_v4 = vunpack.i.l.bf16 %v962_v53 }
 0x1d5   : > { %v560_v16 = vsel %vm559_vm6, %v963_v4, %v953_v59 }
 0x1d6   : > { %v967_v55 = vpop.permute.xlu0 %966  ;;  %v972_v56 = vpop.permute.xlu1 %971 }
 0x1d7   : > { %v969_v60 = vunpack.i.h.bf16 %v967_v55  ;;  %v968_v61 = vunpack.i.l.bf16 %v967_v55  ;;  %v974_v63 = vunpack.i.h.bf16 %v972_v56  ;;  %v973_v1 = vunpack.i.l.bf16 %v972_v56 }
 0x1d9   : > { %v563_v62 = vsel %vm559_vm6, %v968_v61, %v969_v60  ;;  %v562_v13 = vsel %vm559_vm6, %v964_v3, %v968_v61  ;;  %v536_v15 = vsel %vm532_vm11, %v973_v1, %v974_v63  ;;  %vm739_vm6 = vcmask 195584  }
 0x1da   : > { %v629_v5 = vpop.permute.xlu0 %628  ;;  %v631_v6 = vpop.permute.xlu1 %630  ;;  %v885_v14 = vpack.c.bf16 %v563_v62, %v561_v9  ;;  %v888_v21 = vpack.c.bf16 %v562_v13, %v560_v16  ;;  %v891_v25 = vpack.c.bf16 %v536_v15, %v534_v20 }
 0x1db   : > { %v634_v10 = vsel %vm632_vm7, %v629_v5, %v631_v6  ;;  %v633_v11 = vsel %vm632_vm7, %v627_v52, %v629_v5 }
 0x1dc   : > { %660 = vmatprep.subr.bf16.mxu1 %v634_v10 }
 0x1dd   : > { %661 = vmatpush1.bf16.msra.mxu1 %v633_v11 }
 0x1de   : > { %v977_v17 = vpop.permute.xlu0 %976  ;;  %v616_v18 = vpop.permute.xlu1 %615  ;;  %886 = vmatprep.subr.msk.bf16.mxu1 %vm1161_vm10, %v885_v14 }
 0x1df   : > { %v979_v22 = vunpack.i.h.bf16 %v977_v17  ;;  %v978_v23 = vunpack.i.l.bf16 %v977_v17 }
 0x1e1   : > { %v533_v26 = vsel %vm532_vm11, %v978_v23, %v958_v8  ;;  %v535_v27 = vsel %vm532_vm11, %v979_v22, %v973_v1  ;;  %889 = vmatpush1.bf16.msk.msra.mxu1 %vm1173_vm13, %v888_v21 }
 0x1e2   : > { %v894_v28 = vpack.c.bf16 %v535_v27, %v533_v26  ;;  %v620_v29 = vpop.permute.xlu0 %619  ;;  %v987_v30 = vpop.permute.xlu1 %986  ;;  %892 = vmatprep.subr.msk.bf16.mxu1 %vm1178_vm15, %v891_v25 }
 0x1e3   : > { %v989_v32 = vunpack.i.h.bf16 %v987_v30  ;;  %v988_v33 = vunpack.i.l.bf16 %v987_v30 }
 0x1e5   : > { %895 = vmatpush1.bf16.msk.msra.mxu1 %vm1188_vm0, %v894_v28  ;;  %v509_v42 = vsel %vm505_vm2, %v988_v33, %v989_v32 }
 0x1e6   : > { %v982_v35 = vpop.permute.xlu0 %981  ;;  %v618_v36 = vpop.permute.xlu1 %617 }
 0x1e7   : > { %v984_v37 = vunpack.i.h.bf16 %v982_v35  ;;  %v983_v38 = vunpack.i.l.bf16 %v982_v35  ;;  %v623_v40 = vsel %vm621_vm1, %v618_v36, %v620_v29  ;;  %v622_v41 = vsel %vm621_vm1, %v616_v18, %v618_v36 }
 0x1e8   : > { %666 = vmatprep.subr.bf16.mxu1 %v623_v40 }
 0x1e9   : > { %v507_v43 = vsel %vm505_vm2, %v983_v38, %v984_v37  ;;  %667 = vmatpush1.bf16.msra.mxu1 %v622_v41  ;;  %v1031_v41 = vld [vmem:[%s1248_s5 + $0x8] sm:$0xff]  }
 0x1ea   : > { %v897_v44 = vpack.c.bf16 %v509_v42, %v507_v43  ;;  %v992_v45 = vpop.permute.xlu0 %991  ;;  %v997_v46 = vpop.permute.xlu1 %996 }
 0x1eb   : > { %v994_v47 = vunpack.i.h.bf16 %v992_v45  ;;  %v993_v48 = vunpack.i.l.bf16 %v992_v45  ;;  %v999_v51 = vunpack.i.h.bf16 %v997_v46  ;;  %v998_v52 = vunpack.i.l.bf16 %v997_v46 }
 0x1ec   : > { %898 = vmatprep.subr.msk.bf16.mxu1 %vm1161_vm10, %v897_v44 }
 0x1ed   : > { %v506_v49 = vsel %vm505_vm2, %v993_v48, %v983_v38  ;;  %v508_v50 = vsel %vm505_vm2, %v994_v47, %v988_v33  ;;  %v480_v60 = vsel %vm478_vm3, %v998_v52, %v999_v51 }
 0x1ee   : > { %v900_v53 = vpack.c.bf16 %v508_v50, %v506_v49  ;;  %v1002_v54 = vpop.permute.xlu0 %1001  ;;  %v1007_v55 = vpop.permute.xlu1 %1006 }
 0x1ef   : > { %v1004_v56 = vunpack.i.h.bf16 %v1002_v54  ;;  %v1003_v57 = vunpack.i.l.bf16 %v1002_v54  ;;  %v1009_v58 = vunpack.i.h.bf16 %v1007_v55  ;;  %v1008_v59 = vunpack.i.l.bf16 %v1007_v55 }
 0x1f0   : > { %901 = vmatpush1.bf16.msk.msra.mxu1 %vm1173_vm13, %v900_v53 }
 0x1f1   : > { %v482_v61 = vsel %vm478_vm3, %v1003_v57, %v1004_v56  ;;  %v481_v62 = vsel %vm478_vm3, %v1009_v58, %v1003_v57  ;;  %v479_v63 = vsel %vm478_vm3, %v1008_v59, %v998_v52 }
 0x1f2   : > { %v903_v1 = vpack.c.bf16 %v482_v61, %v480_v60  ;;  %v906_v2 = vpack.c.bf16 %v481_v62, %v479_v63  ;;  %v607_v3 = vpop.permute.xlu0 %606  ;;  %v609_v4 = vpop.permute.xlu1 %608 }
 0x1f3   : > { %v612_v5 = vsel %vm610_vm4, %v607_v3, %v609_v4 }
 0x1f4   : > { %904 = vmatprep.subr.msk.bf16.mxu1 %vm1178_vm15, %v903_v1 }
 0x1f5   : > { %907 = vmatpush1.bf16.msk.msra.mxu1 %vm1188_vm0, %v906_v2 }
 0x1f6   : > { %v605_v6 = vpop.permute.xlu0 %604  ;;  %v1012_v7 = vpop.permute.xlu1 %1011  ;;  %672 = vmatprep.subr.bf16.mxu1 %v612_v5 }
 0x1f7   : > { %v611_v8 = vsel %vm610_vm4, %v605_v6, %v607_v3  ;;  %v1014_v9 = vunpack.i.h.bf16 %v1012_v7  ;;  %v1013_v10 = vunpack.i.l.bf16 %v1012_v7 }
 0x1f9   : > { %673 = vmatpush1.bf16.msra.mxu1 %v611_v8  ;;  %v588_v18 = vsel %vm586_vm5, %v1013_v10, %v1014_v9 }
 0x1fa   : > { %v1017_v11 = vpop.permute.xlu0 %1016  ;;  %v1022_v13 = vpop.permute.xlu1 %1021  ;;  %910 = vmatprep.subr.msk.bf16.mxu1 %vm1161_vm10, %v1127_v39  ;;  %v1027_v39 = vld [vmem:[%s1246_s3] ss:$8 sps:$4 sm:$0xff]  }
 0x1fb   : > { %v1019_v14 = vunpack.i.h.bf16 %v1017_v11  ;;  %v1018_v15 = vunpack.i.l.bf16 %v1017_v11  ;;  %v1024_v16 = vunpack.i.h.bf16 %v1022_v13  ;;  %v1023_v17 = vunpack.i.l.bf16 %v1022_v13 }
 0x1fd   : > { %v590_v20 = vsel %vm586_vm5, %v1018_v15, %v1019_v14  ;;  %v589_v21 = vsel %vm586_vm5, %v1024_v16, %v1018_v15  ;;  %v587_v22 = vsel %vm586_vm5, %v1023_v17, %v1013_v10  ;;  %913 = vmatpush1.bf16.msk.msra.mxu1 %vm1173_vm13, %v1124_v34 }
 0x1fe   : > { %v915_v23 = vpack.c.bf16 %v590_v20, %v588_v18  ;;  %v918_v25 = vpack.c.bf16 %v589_v21, %v587_v22 }
 0x200   : > { %916 = vmatprep.subr.msk.bf16.mxu1 %vm1178_vm15, %v915_v23 }
 0x201   : > { %919 = vmatpush2.bf16.msk.msra.mxu1 %vm1188_vm0, %v918_v25 }
 0x204   : > { %693 = vmatmul.mubr.bf16.vlgmr.msra.gmra.mxu1 %v1027_v39 }
 0x207   : > { %v640_v27 = vpop.permute.xlu0 %639  ;;  %v645_v28 = vpop.permute.xlu1 %644 }
 0x20b   : > { %v712_v42 = vpop.permute.xlu0 %711  ;;  %v717_v47 = vpop.permute.xlu1 %716 }
 0x20f   : > { %v722_v54 = vpop.permute.xlu0 %721  ;;  %v727_v61 = vpop.permute.xlu1 %726 }
 0x2c4   : > { %v694_v12 = vpop.f32.mrf.mxu1 }
 0x2c5   : > { %v695_v30 = vadd.f32 %v694_v12, %v640_v27 }
 0x2c6   : > { %v696_v26 = vpop.f32.mrf.mxu1 }
 0x2c7   : > { %v697_v19 = vadd.f32 %v696_v26, %v640_v27  ;;  %v703_v37 = vmax.f32 %v695_v30, 0.0 }
 0x2c8   : > { %v698_v29 = vpop.f32.mrf.mxu1 }
 0x2c9   : > { %v699_v34 = vadd.f32 %v698_v29, %v645_v28  ;;  %v704_v35 = vmax.f32 %v697_v19, 0.0 }
 0x2ca   : > { %v700_v32 = vpop.f32.mrf.mxu1 }
 0x2cb   : > { %v701_v24 = vadd.f32 %v700_v32, %v645_v28  ;;  %v705_v33 = vmax.f32 %v699_v34, 0.0 }
 0x2cd   : > { %v706_v36 = vmax.f32 %v701_v24, 0.0  ;;  %v707_v40 = vpack.c.bf16 %v705_v33, %v703_v37 }
 0x2cf   : > { %v708_v38 = vpack.c.bf16 %v706_v36, %v704_v35 }
 0x2d1   : > { %760 = vmatprep.subr.bf16.mxu0 %v708_v38 }
 0x2d2   : > { %761 = vmatpush1.bf16.msra.mxu0 %v707_v40 }
 0x2d5   : > { %924 = vmatmul.mubr.msk.bf16.vlgmr.msra.gmra.mxu0 %vm739_vm6, %v1030_v31 }
 0x2d6   : > { %788 = vmatprep.mubr.bf16.mxu0 %v1040_v0 }
 0x2dd   : > { %925 = vmatmul.mubr.msk.bf16.gmra.mxu0 %vm739_vm6, %v1031_v41 }
 0x395   : > { %v780_v43 = vpop.f32.mrf.mxu0 }
 0x396   : > { %v781_v44 = vadd.f32 %v780_v43, %v712_v42 }
 0x397   : > { %v782_v45 = vpop.f32.mrf.mxu0 }
 0x398   : > { %v799_v46 = vmax.f32 %v781_v44, 0.0  ;;  %v783_v0 = vadd.f32 %v782_v45, %v712_v42 }
 0x399   : > { %v784_v48 = vpop.f32.mrf.mxu0 }
 0x39a   : > { %807 = vst [vmem:[%s1230_s26] sm:$0xff] %v799_v46  ;;  %v800_v49 = vmax.f32 %v783_v0, 0.0  ;;  %v785_v50 = vadd.f32 %v784_v48, %v717_v47 }
 0x39b   : > { %v786_v51 = vpop.f32.mrf.mxu0 }
 0x39c   : > { %808 = vst [vmem:[%s1230_s26 + $0x8] sm:$0xff] %v800_v49  ;;  %v801_v52 = vmax.f32 %v785_v50, 0.0  ;;  %v787_v53 = vadd.f32 %v786_v51, %v717_v47 }
 0x39d   : > { %v790_v55 = vpop.f32.mrf.mxu0 }
 0x39e   : > { %809 = vst [vmem:[%s1230_s26 + $0x10] sm:$0xff] %v801_v52  ;;  %v802_v56 = vmax.f32 %v787_v53, 0.0  ;;  %v791_v57 = vadd.f32 %v790_v55, %v722_v54 }
 0x39f   : > { %v792_v58 = vpop.f32.mrf.mxu0 }
 0x3a0   : > { %810 = vst [vmem:[%s1230_s26 + $0x18] sm:$0xff] %v802_v56  ;;  %v803_v59 = vmax.f32 %v791_v57, 0.0  ;;  %v793_v60 = vadd.f32 %v792_v58, %v722_v54 }
 0x3a1   : > { %v794_v62 = vpop.f32.mrf.mxu0 }
 0x3a2   : > { %811 = vst [vmem:[%s1230_s26 + $0x20] sm:$0xff] %v803_v59  ;;  %v804_v63 = vmax.f32 %v793_v60, 0.0  ;;  %v795_v1 = vadd.f32 %v794_v62, %v727_v61 }
 0x3a3   : > { %v796_v2 = vpop.f32.mrf.mxu0 }
 0x3a4   : > { %812 = vst [vmem:[%s1230_s26 + $0x28] sm:$0xff] %v804_v63  ;;  %v805_v3 = vmax.f32 %v795_v1, 0.0  ;;  %v797_v4 = vadd.f32 %v796_v2, %v727_v61 }
 0x3a6   : > { %813 = vst [vmem:[%s1230_s26 + $0x30] sm:$0xff] %v805_v3  ;;  %v806_v5 = vmax.f32 %v797_v4, 0.0 }
 0x3a8   : > { %814 = vst [vmem:[%s1230_s26 + $0x38] sm:$0xff] %v806_v5 }
 0x3a9 PF: > { %s17_s24 = sadd.s32 1, %s1038_s24  }
 0x3aa   : > { %p14_p4 = scmp.ge.s32.totalorder %s17_s24, 4  }
 0x3ac   :  { %16 = sbr.rel (!%p14_p4) target bundleno = 1 (0x1), region = 78 }

</bundles_post_ra>
